<compile_context>
chip_gen: v7x
topology: tpu7x:2x2x1
jax: 0.10.0
libtpu: 0.0.40
codegen_flags: <defaults>
</compile_context>

<pallas_src>
import jax
import jax.numpy as jnp
from jax import lax
from jax.experimental import pallas as pl

# Small synthetic shapes consistent with the module.
N, CIN, COUT, H, W = 2, 4, 8, 16, 16
KH = KW = 3
EPS = 1e-5                     # PyTorch BatchNorm2d default

HP, WP = H + 2, W + 2          # spatially padded frame (18, 18)
L_IMG = HP * WP                # 324 flat padded pixels per image
L_VALID = N * L_IMG            # 648 real flat positions
M = N * H * W                  # 512 valid conv / BN pixels
L_OUT = 768                    # lane-dense output width (6 * 128 >= L_VALID)
L_IN = 896                     # input lanes (7 * 128 >= L_OUT + max tap shift 38)


def basic_block_kernel(x_ref, w_ref, gb_ref, mask_ref, o_ref):
    # x_ref:    [CIN, L_IN]    bf16  zero-padded input, flat (ci | n, y', x')
    # w_ref:    [9, COUT, CIN] bf16  conv weights per tap (tap = dy*3 + dx)
    # gb_ref:   [COUT, 2]      f32   column 0 = gamma, column 1 = beta
    # mask_ref: [1, L_OUT]     f32   1.0 at the M valid output pixels, else 0.0
    # o_ref:    [COUT, L_OUT]  f32   lane-dense output slab
    x = x_ref[...]                                     # [CIN, L_IN] bf16
    mask = mask_ref[...]                               # [1, L_OUT]  f32

    # Conv: 9 shifted views of the padded frame (static lane-offset slices),
    # each contracted over CIN on the MXU; accumulate in f32.
    acc = None
    for tap in range(KH * KW):
        dy, dx = divmod(tap, KW)
        shift = dy * WP + dx                           # 0 .. 38 (static)
        part = jnp.dot(w_ref[tap], x[:, shift:shift + L_OUT],
                       preferred_element_type=jnp.float32)    # [COUT, L_OUT]
        acc = part if acc is None else acc + part

    # BatchNorm2d training-mode batch statistics over the M valid pixels
    # (two-pass: mean, then variance of masked centered values; biased var).
    inv_m = 1.0 / M
    mean = jnp.sum(acc * mask, axis=1, keepdims=True) * inv_m       # [COUT,1]
    centered = acc - mean
    var = jnp.sum(centered * centered * mask, axis=1, keepdims=True) * inv_m

    gamma = gb_ref[:, 0:1]                                          # [COUT,1]
    beta = gb_ref[:, 1:2]
    scale = gamma * lax.rsqrt(var + EPS)

    # Affine + ReLU, single unmasked full-width lane-dense store.
    o_ref[...] = jnp.maximum(centered * scale + beta, 0.0)


@jax.jit
def basic_block(x, w, gamma, beta):
    # Cheap layout plumbing (~16 KB): zero-pad spatially (conv padding=1),
    # channels on sublanes, flat (n, y', x') padded-pixel index on lanes.
    xp = jnp.pad(x, ((0, 0), (0, 0), (1, 1), (1, 1)))           # [N,CIN,18,18]
    xf = xp.transpose(1, 0, 2, 3).reshape(CIN, L_VALID)         # [CIN, 648]
    xf = jnp.pad(xf, ((0, 0), (0, L_IN - L_VALID)))             # [CIN, 896]
    xf = xf.astype(jnp.bfloat16)

    w9 = w.transpose(2, 3, 0, 1).reshape(KH * KW, COUT, CIN)    # [9, COUT, CIN]
    w9 = w9.astype(jnp.bfloat16)

    gb = jnp.stack([gamma, beta], axis=1).astype(jnp.float32)   # [COUT, 2]

    # Validity mask over the lane-dense padded-frame output (constant folded).
    q = jnp.arange(L_OUT)
    n_idx = q // L_IMG
    r = q % L_IMG
    valid = (n_idx < N) & ((r // WP) < H) & ((r % WP) < W)
    mask = valid.astype(jnp.float32).reshape(1, L_OUT)

    out = pl.pallas_call(
        basic_block_kernel,
        out_shape=jax.ShapeDtypeStruct((COUT, L_OUT), jnp.float32),
    )(xf, w9, gb, mask)

    # Back to NCHW: keep the valid 16x16 window of each image.
    out = out[:, :L_VALID].reshape(COUT, N, HP, WP)[:, :, :H, :W]
    return out.transpose(1, 0, 2, 3)                            # [N,COUT,H,W]
    # TODO(synk): at real ResNet shapes (H,W >= 56, CIN >= 64) tile the pixel
    # axis with a reduction-style ("arbitrary") grid dimension, stream
    # per-channel sum / sum-of-squares into VMEM scratch, finalize
    # scale/shift + ReLU under @pl.when(last step), and set vmem_limit_bytes
    # explicitly (v7x has only 64 MiB physical VMEM) instead of whole-array
    # residency.
    # TODO(synk): nn.BatchNorm2d's running_mean/running_var update is not
    # produced (forward output with batch stats only).


def reference(x, w, gamma, beta):
    conv = lax.conv_general_dilated(
        x, w, window_strides=(1, 1), padding=((1, 1), (1, 1)),
        dimension_numbers=("NCHW", "OIHW", "NCHW"))
    mean = conv.mean(axis=(0, 2, 3), keepdims=True)
    var = ((conv - mean) ** 2).mean(axis=(0, 2, 3), keepdims=True)
    y = (conv - mean) / jnp.sqrt(var + EPS)
    y = y * gamma.reshape(1, -1, 1, 1) + beta.reshape(1, -1, 1, 1)
    return jnp.maximum(y, 0.0)


if __name__ == "__main__":
    key = jax.random.PRNGKey(0)
    kx, kw, kg, kb = jax.random.split(key, 4)

    # Deterministic synthetic parameters (shapes from Basic_block.__init__).
    x = jax.random.normal(kx, (N, CIN, H, W), jnp.float32)
    w = jax.random.normal(kw, (COUT, CIN, KH, KW), jnp.float32) * 0.1
    gamma = 1.0 + 0.1 * jax.random.normal(kg, (COUT,), jnp.float32)
    beta = 0.1 * jax.random.normal(kb, (COUT,), jnp.float32)

    out = basic_block(x, w, gamma, beta)
    jax.block_until_ready(out)
    assert out.shape == (N, COUT, H, W)

    # Kernel correctness: reference evaluated with the same bf16-rounded conv
    # operands the MXU sees (accumulation in f32 on both sides).
    xq = x.astype(jnp.bfloat16).astype(jnp.float32)
    wq = w.astype(jnp.bfloat16).astype(jnp.float32)
    ref_q = reference(xq, wq, gamma, beta)
    err = jnp.max(jnp.abs(out - ref_q))
    assert jnp.allclose(out, ref_q, atol=2e-3, rtol=2e-3), f"max abs err = {err}"

    # End-to-end fidelity vs. the full-f32 module (loose: bf16 conv operands).
    ref = reference(x, w, gamma, beta)
    assert jnp.allclose(out, ref, atol=5e-2, rtol=5e-2)

    print("KERNEL_OK")
</pallas_src>

<mosaic_0001>
module attributes {stable_mosaic.version = 11 : i64} {
  func.func @basic_block_kernel(%arg0: memref<4x896xbf16, #tpu.memory_space<vmem>>, %arg1: memref<9x8x4xbf16, #tpu.memory_space<vmem>>, %arg2: memref<8x2xf32, #tpu.memory_space<vmem>>, %arg3: memref<1x768xf32, #tpu.memory_space<vmem>>, %arg4: memref<8x768xf32, #tpu.memory_space<vmem>>) attributes {dimension_semantics = [], scalar_prefetch = 0 : i64, scratch_operands = 0 : i64, tpu.core_type = #tpu.core_type<tc>} {
    %c0 = arith.constant 0 : index
    %c0_0 = arith.constant 0 : index
    %0 = vector.load %arg0[%c0, %c0_0] : memref<4x896xbf16, #tpu.memory_space<vmem>>, vector<4x896xbf16>
    %c0_1 = arith.constant 0 : index
    %c0_2 = arith.constant 0 : index
    %1 = vector.load %arg3[%c0_1, %c0_2] : memref<1x768xf32, #tpu.memory_space<vmem>>, vector<1x768xf32>
    %c0_3 = arith.constant 0 : index
    %c0_4 = arith.constant 0 : index
    %c0_5 = arith.constant 0 : index
    %2 = vector.load %arg1[%c0_3, %c0_4, %c0_5] : memref<9x8x4xbf16, #tpu.memory_space<vmem>>, vector<1x8x4xbf16>
    %3 = vector.shape_cast %2 : vector<1x8x4xbf16> to vector<8x4xbf16>
    %4 = vector.extract_strided_slice %0 {offsets = [0, 0], sizes = [4, 768], strides = [1, 1]} : vector<4x896xbf16> to vector<4x768xbf16>
    %cst = arith.constant dense<0.000000e+00> : vector<8x768xf32>
    %5 = tpu.matmul %3, %4, %cst {dimension_numbers = #tpu.dot_dimension_numbers<[1], [0], [0], [1], [0, 0, 1, 1], [], []>} : vector<8x4xbf16>, vector<4x768xbf16>, vector<8x768xf32> -> vector<8x768xf32>
    %c1 = arith.constant 1 : index
    %c0_6 = arith.constant 0 : index
    %c0_7 = arith.constant 0 : index
    %6 = vector.load %arg1[%c1, %c0_6, %c0_7] : memref<9x8x4xbf16, #tpu.memory_space<vmem>>, vector<1x8x4xbf16>
    %7 = vector.shape_cast %6 : vector<1x8x4xbf16> to vector<8x4xbf16>
    %8 = vector.extract_strided_slice %0 {offsets = [0, 1], sizes = [4, 768], strides = [1, 1]} : vector<4x896xbf16> to vector<4x768xbf16>
    %cst_8 = arith.constant dense<0.000000e+00> : vector<8x768xf32>
    %9 = tpu.matmul %7, %8, %cst_8 {dimension_numbers = #tpu.dot_dimension_numbers<[1], [0], [0], [1], [0, 0, 1, 1], [], []>} : vector<8x4xbf16>, vector<4x768xbf16>, vector<8x768xf32> -> vector<8x768xf32>
    %10 = arith.addf %5, %9 : vector<8x768xf32>
    %c2 = arith.constant 2 : index
    %c0_9 = arith.constant 0 : index
    %c0_10 = arith.constant 0 : index
    %11 = vector.load %arg1[%c2, %c0_9, %c0_10] : memref<9x8x4xbf16, #tpu.memory_space<vmem>>, vector<1x8x4xbf16>
    %12 = vector.shape_cast %11 : vector<1x8x4xbf16> to vector<8x4xbf16>
    %13 = vector.extract_strided_slice %0 {offsets = [0, 2], sizes = [4, 768], strides = [1, 1]} : vector<4x896xbf16> to vector<4x768xbf16>
    %cst_11 = arith.constant dense<0.000000e+00> : vector<8x768xf32>
    %14 = tpu.matmul %12, %13, %cst_11 {dimension_numbers = #tpu.dot_dimension_numbers<[1], [0], [0], [1], [0, 0, 1, 1], [], []>} : vector<8x4xbf16>, vector<4x768xbf16>, vector<8x768xf32> -> vector<8x768xf32>
    %15 = arith.addf %10, %14 : vector<8x768xf32>
    %c3 = arith.constant 3 : index
    %c0_12 = arith.constant 0 : index
    %c0_13 = arith.constant 0 : index
    %16 = vector.load %arg1[%c3, %c0_12, %c0_13] : memref<9x8x4xbf16, #tpu.memory_space<vmem>>, vector<1x8x4xbf16>
    %17 = vector.shape_cast %16 : vector<1x8x4xbf16> to vector<8x4xbf16>
    %18 = vector.extract_strided_slice %0 {offsets = [0, 18], sizes = [4, 768], strides = [1, 1]} : vector<4x896xbf16> to vector<4x768xbf16>
    %cst_14 = arith.constant dense<0.000000e+00> : vector<8x768xf32>
    %19 = tpu.matmul %17, %18, %cst_14 {dimension_numbers = #tpu.dot_dimension_numbers<[1], [0], [0], [1], [0, 0, 1, 1], [], []>} : vector<8x4xbf16>, vector<4x768xbf16>, vector<8x768xf32> -> vector<8x768xf32>
    %20 = arith.addf %15, %19 : vector<8x768xf32>
    %c4 = arith.constant 4 : index
    %c0_15 = arith.constant 0 : index
    %c0_16 = arith.constant 0 : index
    %21 = vector.load %arg1[%c4, %c0_15, %c0_16] : memref<9x8x4xbf16, #tpu.memory_space<vmem>>, vector<1x8x4xbf16>
    %22 = vector.shape_cast %21 : vector<1x8x4xbf16> to vector<8x4xbf16>
    %23 = vector.extract_strided_slice %0 {offsets = [0, 19], sizes = [4, 768], strides = [1, 1]} : vector<4x896xbf16> to vector<4x768xbf16>
    %cst_17 = arith.constant dense<0.000000e+00> : vector<8x768xf32>
    %24 = tpu.matmul %22, %23, %cst_17 {dimension_numbers = #tpu.dot_dimension_numbers<[1], [0], [0], [1], [0, 0, 1, 1], [], []>} : vector<8x4xbf16>, vector<4x768xbf16>, vector<8x768xf32> -> vector<8x768xf32>
    %25 = arith.addf %20, %24 : vector<8x768xf32>
    %c5 = arith.constant 5 : index
    %c0_18 = arith.constant 0 : index
    %c0_19 = arith.constant 0 : index
    %26 = vector.load %arg1[%c5, %c0_18, %c0_19] : memref<9x8x4xbf16, #tpu.memory_space<vmem>>, vector<1x8x4xbf16>
    %27 = vector.shape_cast %26 : vector<1x8x4xbf16> to vector<8x4xbf16>
    %28 = vector.extract_strided_slice %0 {offsets = [0, 20], sizes = [4, 768], strides = [1, 1]} : vector<4x896xbf16> to vector<4x768xbf16>
    %cst_20 = arith.constant dense<0.000000e+00> : vector<8x768xf32>
    %29 = tpu.matmul %27, %28, %cst_20 {dimension_numbers = #tpu.dot_dimension_numbers<[1], [0], [0], [1], [0, 0, 1, 1], [], []>} : vector<8x4xbf16>, vector<4x768xbf16>, vector<8x768xf32> -> vector<8x768xf32>
    %30 = arith.addf %25, %29 : vector<8x768xf32>
    %c6 = arith.constant 6 : index
    %c0_21 = arith.constant 0 : index
    %c0_22 = arith.constant 0 : index
    %31 = vector.load %arg1[%c6, %c0_21, %c0_22] : memref<9x8x4xbf16, #tpu.memory_space<vmem>>, vector<1x8x4xbf16>
    %32 = vector.shape_cast %31 : vector<1x8x4xbf16> to vector<8x4xbf16>
    %33 = vector.extract_strided_slice %0 {offsets = [0, 36], sizes = [4, 768], strides = [1, 1]} : vector<4x896xbf16> to vector<4x768xbf16>
    %cst_23 = arith.constant dense<0.000000e+00> : vector<8x768xf32>
    %34 = tpu.matmul %32, %33, %cst_23 {dimension_numbers = #tpu.dot_dimension_numbers<[1], [0], [0], [1], [0, 0, 1, 1], [], []>} : vector<8x4xbf16>, vector<4x768xbf16>, vector<8x768xf32> -> vector<8x768xf32>
    %35 = arith.addf %30, %34 : vector<8x768xf32>
    %c7 = arith.constant 7 : index
    %c0_24 = arith.constant 0 : index
    %c0_25 = arith.constant 0 : index
    %36 = vector.load %arg1[%c7, %c0_24, %c0_25] : memref<9x8x4xbf16, #tpu.memory_space<vmem>>, vector<1x8x4xbf16>
    %37 = vector.shape_cast %36 : vector<1x8x4xbf16> to vector<8x4xbf16>
    %38 = vector.extract_strided_slice %0 {offsets = [0, 37], sizes = [4, 768], strides = [1, 1]} : vector<4x896xbf16> to vector<4x768xbf16>
    %cst_26 = arith.constant dense<0.000000e+00> : vector<8x768xf32>
    %39 = tpu.matmul %37, %38, %cst_26 {dimension_numbers = #tpu.dot_dimension_numbers<[1], [0], [0], [1], [0, 0, 1, 1], [], []>} : vector<8x4xbf16>, vector<4x768xbf16>, vector<8x768xf32> -> vector<8x768xf32>
    %40 = arith.addf %35, %39 : vector<8x768xf32>
    %c8 = arith.constant 8 : index
    %c0_27 = arith.constant 0 : index
    %c0_28 = arith.constant 0 : index
    %41 = vector.load %arg1[%c8, %c0_27, %c0_28] : memref<9x8x4xbf16, #tpu.memory_space<vmem>>, vector<1x8x4xbf16>
    %42 = vector.shape_cast %41 : vector<1x8x4xbf16> to vector<8x4xbf16>
    %43 = vector.extract_strided_slice %0 {offsets = [0, 38], sizes = [4, 768], strides = [1, 1]} : vector<4x896xbf16> to vector<4x768xbf16>
    %cst_29 = arith.constant dense<0.000000e+00> : vector<8x768xf32>
    %44 = tpu.matmul %42, %43, %cst_29 {dimension_numbers = #tpu.dot_dimension_numbers<[1], [0], [0], [1], [0, 0, 1, 1], [], []>} : vector<8x4xbf16>, vector<4x768xbf16>, vector<8x768xf32> -> vector<8x768xf32>
    %45 = arith.addf %40, %44 : vector<8x768xf32>
    %46 = vector.broadcast %1 : vector<1x768xf32> to vector<8x768xf32>
    %47 = arith.mulf %45, %46 : vector<8x768xf32>
    %cst_30 = arith.constant dense<0.000000e+00> : vector<8xf32>
    %48 = vector.multi_reduction <add>, %47, %cst_30 [1] : vector<8x768xf32> to vector<8xf32>
    %49 = vector.shape_cast %48 : vector<8xf32> to vector<8x1xf32>
    %cst_31 = arith.constant 0.001953125 : f32
    %50 = vector.broadcast %cst_31 : f32 to vector<8x1xf32>
    %51 = arith.mulf %49, %50 : vector<8x1xf32>
    %52 = vector.broadcast %51 : vector<8x1xf32> to vector<8x768xf32>
    %53 = arith.subf %45, %52 : vector<8x768xf32>
    %54 = arith.mulf %53, %53 : vector<8x768xf32>
    %55 = vector.broadcast %1 : vector<1x768xf32> to vector<8x768xf32>
    %56 = arith.mulf %54, %55 : vector<8x768xf32>
    %cst_32 = arith.constant dense<0.000000e+00> : vector<8xf32>
    %57 = vector.multi_reduction <add>, %56, %cst_32 [1] : vector<8x768xf32> to vector<8xf32>
    %58 = vector.shape_cast %57 : vector<8xf32> to vector<8x1xf32>
    %cst_33 = arith.constant 0.001953125 : f32
    %59 = vector.broadcast %cst_33 : f32 to vector<8x1xf32>
    %60 = arith.mulf %58, %59 : vector<8x1xf32>
    %c0_34 = arith.constant 0 : index
    %c0_35 = arith.constant 0 : index
    %61 = vector.load %arg2[%c0_34, %c0_35] : memref<8x2xf32, #tpu.memory_space<vmem>>, vector<8x1xf32>
    %c0_36 = arith.constant 0 : index
    %c1_37 = arith.constant 1 : index
    %62 = vector.load %arg2[%c0_36, %c1_37] : memref<8x2xf32, #tpu.memory_space<vmem>>, vector<8x1xf32>
    %cst_38 = arith.constant 9.99999974E-6 : f32
    %63 = vector.broadcast %cst_38 : f32 to vector<8x1xf32>
    %64 = arith.addf %60, %63 : vector<8x1xf32>
    %65 = math.rsqrt %64 : vector<8x1xf32>
    %66 = arith.mulf %61, %65 : vector<8x1xf32>
    %67 = vector.broadcast %66 : vector<8x1xf32> to vector<8x768xf32>
    %68 = arith.mulf %53, %67 : vector<8x768xf32>
    %69 = vector.broadcast %62 : vector<8x1xf32> to vector<8x768xf32>
    %70 = arith.addf %68, %69 : vector<8x768xf32>
    %cst_39 = arith.constant 0.000000e+00 : f32
    %71 = vector.broadcast %cst_39 : f32 to vector<8x768xf32>
    %72 = arith.maximumf %70, %71 : vector<8x768xf32>
    %c0_40 = arith.constant 0 : index
    %c0_41 = arith.constant 0 : index
    %73 = vector.load %arg4[%c0_40, %c0_41] : memref<8x768xf32, #tpu.memory_space<vmem>>, vector<8x768xf32>
    tpu.vector_store %arg4[%c0_40, %c0_41], %72 {strides = array<i32>} : memref<8x768xf32, #tpu.memory_space<vmem>>, vector<8x768xf32>,
    return
  }
}

</mosaic_0001>

<bundles_post_ra>
// kernel: basic_block.1
= control target key start
LH: loop header
LB: loop body
LE: loop exit
PB: predicated region body
PF: predicated region fallthrough
CT: control target
= control target key end

     0   :  { %v30_v0 = vlaneseq  ;;  %v1866_v2 = vmov 1983009808   ;;  %v1867_v7 = vmov 0   ;;  %s1868_s19 = smov 127   ;;  %s1870_s20 = smov 110   ;;  %vm73_vm0 = vcmask 1039360   ;;  %s2220_s0 = inlined_call_operand.vmem [shape: bf16[4,896], index: 0, kind: input, shape index: {}]   ;;  %s2221_s1 = inlined_call_operand.vmem [shape: bf16[9,8,4], index: 1, kind: input, shape index: {}]   ;;  %s2222_s3 = inlined_call_operand.vmem [shape: f32[1,768], index: 3, kind: input, shape index: {}]   ;;  %s2223_s2 = inlined_call_operand.vmem [shape: f32[8,2], index: 2, kind: input, shape index: {}]   ;;  %s2224_s4 = inlined_call_operand.vmem [shape: f32[8,768], index: 4, kind: output, shape index: {}]  }
   0x1   :  { %v18_v1 = vld [vmem:[%s2220_s0] sm:$0xff]  ;;  %v28_v3 = vunpack.c.l.s4 %v1866_v2  ;;  %135 = vmatprep.mubr.bf16.mxu1 %v1867_v7  ;;  %446 = vmatprep.mubr.bf16.mxu0 %v1867_v7  ;;  %v19_v9 = vld [vmem:[%s2220_s0 + $0x8] sm:$0x3f]  ;;  %s1869_s0 = smov 126   ;;  %s1871_s21 = smov 109   ;;  %vm84_vm1 = vcmask 1041408  }
   0x2   :  { %v1905_v4 = vshrl.u32 %v30_v0, 7  ;;  %v26_v6 = vcombine.high %v18_v1, %v18_v1  ;;  %1859 = vset.pattern.permute.xlu0 %v1867_v7  ;;  %v43_v16 = vcombine.high %v19_v9, %v19_v9  ;;  %s1872_s22 = smov 108   ;;  %s1873_s23 = smov 92   ;;  %v1694_v26 = vld [vmem:[%s2221_s1 + $0x4] sm:$0xf]  ;;  %vm80_vm2 = vcmask 31744  }
   0x3   :  { %v29_v5 = vunpack.c.0.s8 %v28_v3  ;;  %s1874_s24 = smov 91   ;;  %s1875_s25 = smov 90   ;;  %vm386_vm3 = vcmask 1031168   ;;  %v2008_v41 = vld [vmem:[%s2221_s1 + $0x8] sm:$0xf]  ;;  %vm559_vm4 = vcmask 900096  }
   0x4   :  { %v21_v55 = vld [vmem:[%s2221_s1] sm:$0xf]  ;;  %v2046_v60 = vld [vmem:[%s2221_s1 + $0xc] sm:$0xf]  ;;  %vm732_vm5 = vcmask 891904   ;;  %vm905_vm6 = vcmask 883712  }
   0x5   :  { %v32_v8 = vsub.s32 %v29_v5, %v1905_v4  ;;  %vm1078_vm7 = vcmask 752640   ;;  %vm1251_vm8 = vcmask 744448   ;;  %vm1424_vm9 = vcmask 736256  }
   0x7   :  { %v1914_v10 = vrot.slane %v18_v1, %v32_v8  ;;  %v1916_v11 = vrot.slane %v26_v6, %v32_v8  ;;  %v1928_v14 = vrot.slane %v19_v9, %v32_v8  ;;  %v57_v17 = vrot.slane %v43_v16, %v32_v8 }
   0x9   :  { %59 = vrot.lane.b32.xlu0 %v1914_v10, %s1868_s19  ;;  %63 = vrot.lane.b32.xlu1 %v1916_v11, %s1868_s19  ;;  %v1922_v12 = vcombine.high %v1914_v10, %v1914_v10  ;;  %v1926_v13 = vcombine.high %v1916_v11, %v1916_v11  ;;  %v1934_v15 = vcombine.high %v1928_v14, %v1928_v14  ;;  %v230_v48 = vsel %vm84_vm1, %v1914_v10, 0 }
   0xa   :  { %v236_v58 = vsel %vm84_vm1, %v1916_v11, 0  ;;  %v242_v3 = vsel %vm84_vm1, %v1928_v14, 0 }
   0xd   :  { %61 = vrot.lane.b32.xlu0 %v1922_v12, %s1868_s19  ;;  %65 = vrot.lane.b32.xlu1 %v1926_v13, %s1868_s19 }
  0x11   :  { %67 = vrot.lane.b32.xlu0 %v1928_v14, %s1868_s19  ;;  %69 = vrot.lane.b32.xlu1 %v1934_v15, %s1868_s19 }
  0x15   :  { %71 = vrot.lane.b32.xlu0 %v57_v17, %s1868_s19  ;;  %372 = vrot.lane.b32.xlu1 %v1914_v10, %s1869_s0 }
  0x19   :  { %374 = vrot.lane.b32.xlu0 %v1922_v12, %s1869_s0  ;;  %376 = vrot.lane.b32.xlu1 %v1916_v11, %s1869_s0 }
  0x1d   :  { %380 = vrot.lane.b32.xlu0 %v1928_v14, %s1869_s0  ;;  %382 = vrot.lane.b32.xlu1 %v1934_v15, %s1869_s0 }
  0x21   :  { %384 = vrot.lane.b32.xlu0 %v57_v17, %s1869_s0  ;;  %545 = vrot.lane.b32.xlu1 %v1914_v10, %s1870_s20 }
  0x25   :  { %547 = vrot.lane.b32.xlu0 %v1922_v12, %s1870_s20  ;;  %549 = vrot.lane.b32.xlu1 %v1916_v11, %s1870_s20 }
  0x29   :  { %553 = vrot.lane.b32.xlu0 %v1928_v14, %s1870_s20  ;;  %555 = vrot.lane.b32.xlu1 %v1934_v15, %s1870_s20 }
  0x2d   :  { %557 = vrot.lane.b32.xlu0 %v57_v17, %s1870_s20  ;;  %378 = vrot.lane.b32.xlu1 %v1926_v13, %s1869_s0 }
  0x31   :  { %718 = vrot.lane.b32.xlu0 %v1914_v10, %s1871_s21  ;;  %720 = vrot.lane.b32.xlu1 %v1922_v12, %s1871_s21 }
  0x35   :  { %722 = vrot.lane.b32.xlu0 %v1916_v11, %s1871_s21  ;;  %726 = vrot.lane.b32.xlu1 %v1928_v14, %s1871_s21 }
  0x39   :  { %728 = vrot.lane.b32.xlu0 %v1934_v15, %s1871_s21  ;;  %730 = vrot.lane.b32.xlu1 %v57_v17, %s1871_s21 }
  0x3d   :  { %551 = vrot.lane.b32.xlu0 %v1926_v13, %s1870_s20  ;;  %891 = vrot.lane.b32.xlu1 %v1914_v10, %s1872_s22 }
  0x41   :  { %893 = vrot.lane.b32.xlu0 %v1922_v12, %s1872_s22  ;;  %895 = vrot.lane.b32.xlu1 %v1916_v11, %s1872_s22 }
  0x45   :  { %724 = vrot.lane.b32.xlu0 %v1926_v13, %s1871_s21  ;;  %899 = vrot.lane.b32.xlu1 %v1928_v14, %s1872_s22 }
  0x49   :  { %901 = vrot.lane.b32.xlu0 %v1934_v15, %s1872_s22  ;;  %903 = vrot.lane.b32.xlu1 %v57_v17, %s1872_s22 }
  0x4d   :  { %1064 = vrot.lane.b32.xlu0 %v1914_v10, %s1873_s23  ;;  %1066 = vrot.lane.b32.xlu1 %v1922_v12, %s1873_s23 }
  0x51   :  { %1068 = vrot.lane.b32.xlu0 %v1916_v11, %s1873_s23  ;;  %897 = vrot.lane.b32.xlu1 %v1926_v13, %s1872_s22 }
  0x55   :  { %1072 = vrot.lane.b32.xlu0 %v1928_v14, %s1873_s23  ;;  %1074 = vrot.lane.b32.xlu1 %v1934_v15, %s1873_s23 }
  0x59   :  { %1076 = vrot.lane.b32.xlu0 %v57_v17, %s1873_s23  ;;  %1070 = vrot.lane.b32.xlu1 %v1926_v13, %s1873_s23 }
  0x5d   :  { %1237 = vrot.lane.b32.xlu0 %v1914_v10, %s1874_s24  ;;  %1239 = vrot.lane.b32.xlu1 %v1922_v12, %s1874_s24 }
  0x61   :  { %1241 = vrot.lane.b32.xlu0 %v1916_v11, %s1874_s24  ;;  %1245 = vrot.lane.b32.xlu1 %v1928_v14, %s1874_s24 }
  0x65   :  { %1247 = vrot.lane.b32.xlu0 %v1934_v15, %s1874_s24  ;;  %1249 = vrot.lane.b32.xlu1 %v57_v17, %s1874_s24 }
  0x69   :  { %1243 = vrot.lane.b32.xlu0 %v1926_v13, %s1874_s24  ;;  %1410 = vrot.lane.b32.xlu1 %v1914_v10, %s1875_s25 }
  0x6d   :  { %1412 = vrot.lane.b32.xlu0 %v1922_v12, %s1875_s25  ;;  %1414 = vrot.lane.b32.xlu1 %v1916_v11, %s1875_s25 }
  0x71   :  { %1416 = vrot.lane.b32.xlu0 %v1926_v13, %s1875_s25  ;;  %1418 = vrot.lane.b32.xlu1 %v1928_v14, %s1875_s25 }
  0x75   :  { %1420 = vrot.lane.b32.xlu0 %v1934_v15, %s1875_s25  ;;  %1422 = vrot.lane.b32.xlu1 %v57_v17, %s1875_s25 }
  0x7b   :  { %v60_v18 = vpop.permute.xlu0 %59  ;;  %v64_v19 = vpop.permute.xlu1 %63 }
  0x7f   :  { %v62_v20 = vpop.permute.xlu0 %61  ;;  %v66_v21 = vpop.permute.xlu1 %65 }
  0x80   :  { %v75_v22 = vsel %vm73_vm0, %v62_v20, %v64_v19  ;;  %v74_v23 = vsel %vm73_vm0, %v60_v18, %v62_v20  ;;  %v76_v25 = vsel %vm73_vm0, %v64_v19, %v66_v21  ;;  %v2080_v18 = vld [vmem:[%s2221_s1 + $0x10] sm:$0xf] }
  0x81   :  { %1695 = vmatprep.subr.msk.bf16.mxu1 %vm84_vm1, %v75_v22  ;;  %v86_v24 = vsel %vm84_vm1, %v74_v23, 0  ;;  %v92_v30 = vsel %vm84_vm1, %v76_v25, 0 }
  0x82   :  { %104 = vmatpush1.bf16.msra.mxu1 %v86_v24 }
  0x83   :  { %v68_v27 = vpop.permute.xlu0 %67  ;;  %v70_v28 = vpop.permute.xlu1 %69 }
  0x84   :  { %v77_v29 = vsel %vm73_vm0, %v66_v21, %v68_v27  ;;  %v78_v34 = vsel %vm73_vm0, %v68_v27, %v70_v28 }
  0x85   :  { %1696 = vmatmul.mubr.msk.bf16.vlgmr.msra.gmra.mrb[0].mxu1 %vm80_vm2, %v1694_v26  ;;  %1697 = vmatprep.subr.msk.bf16.mxu1 %vm84_vm1, %v77_v29  ;;  %v98_v39 = vsel %vm84_vm1, %v78_v34, 0 }
  0x86   :  { %145 = vmatpush1.bf16.msra.mxu1 %v92_v30  ;;  %176 = vmatprep.mubr.bf16.mxu1 %v1867_v7 }
  0x87   :  { %v72_v31 = vpop.permute.xlu0 %71  ;;  %v373_v32 = vpop.permute.xlu1 %372 }
  0x88   :  { %v79_v33 = vsel %vm73_vm0, %v70_v28, %v72_v31 }
  0x89   :  { %1699 = vmatprep.subr.msk.bf16.mxu1 %vm84_vm1, %v79_v33 }
  0x8b   :  { %v375_v35 = vpop.permute.xlu0 %374  ;;  %v1996_v36 = vpop.permute.xlu1 %376 }
  0x8c   :  { %v388_v37 = vsel %vm386_vm3, %v375_v35, %v1996_v36  ;;  %v387_v38 = vsel %vm386_vm3, %v373_v32, %v375_v35 }
  0x8d   :  { %1698 = vmatmul.mubr.msk.bf16.vlgmr.msra.gmra.mrb[4].mxu1 %vm80_vm2, %v1694_v26  ;;  %1708 = vmatprep.subr.msk.bf16.mxu0 %vm84_vm1, %v388_v37  ;;  %v397_v40 = vsel %vm84_vm1, %v387_v38, 0  ;;  %v1728_v38 = vld [vmem:[%s2221_s1 + $0x14] sm:$0xf] }
  0x8e   :  { %186 = vmatpush1.bf16.msra.mxu1 %v98_v39  ;;  %415 = vmatpush1.bf16.msra.mxu0 %v397_v40 }
  0x8f   :  { %v381_v42 = vpop.permute.xlu0 %380  ;;  %v383_v43 = vpop.permute.xlu1 %382  ;;  %217 = vmatprep.mubr.bf16.mxu1 %v1867_v7  ;;  %1701 = vmatprep.subr.msk.bf16.mxu1 %vm84_vm1, %v1922_v12 }
  0x90   :  { %v391_v44 = vsel %vm386_vm3, %v381_v42, %v383_v43 }
  0x91   :  { %1709 = vmatmul.mubr.msk.bf16.vlgmr.msra.gmra.mrb[0].mxu0 %vm80_vm2, %v2008_v41  ;;  %v409_v45 = vsel %vm84_vm1, %v391_v44, 0 }
  0x92   :  { %528 = vmatprep.mubr.bf16.mxu0 %v1867_v7 }
  0x93   :  { %v385_v46 = vpop.permute.xlu0 %384  ;;  %v546_v47 = vpop.permute.xlu1 %545 }
  0x94   :  { %v392_v49 = vsel %vm386_vm3, %v383_v43, %v385_v46 }
  0x95   :  { %1700 = vmatmul.mubr.msk.bf16.vlgmr.msra.gmra.mrb[8].mxu1 %vm80_vm2, %v1694_v26  ;;  %1712 = vmatprep.subr.msk.bf16.mxu0 %vm84_vm1, %v392_v49 }
  0x96   :  { %248 = vmatpush1.bf16.msra.mxu1 %v230_v48  ;;  %497 = vmatpush1.bf16.msra.mxu0 %v409_v45 }
  0x97   :  { %v548_v50 = vpop.permute.xlu0 %547  ;;  %v2023_v51 = vpop.permute.xlu1 %549  ;;  %279 = vmatprep.mubr.bf16.mxu1 %v1867_v7  ;;  %1703 = vmatprep.subr.msk.bf16.mxu1 %vm84_vm1, %v1926_v13 }
  0x98   :  { %v560_v52 = vsel %vm559_vm4, %v546_v47, %v548_v50  ;;  %v561_v53 = vsel %vm559_vm4, %v548_v50, %v2023_v51 }
  0x99   :  { %v570_v54 = vsel %vm84_vm1, %v560_v52, 0  ;;  %1713 = vmatmul.mubr.msk.bf16.vlgmr.msra.gmra.mrb[4].mxu0 %vm80_vm2, %v2008_v41  ;;  %1715 = vmatprep.subr.msk.bf16.mxu0 %vm84_vm1, %v561_v53 }
  0x9a   :  { %588 = vmatpush1.bf16.msra.mxu0 %v570_v54  ;;  %619 = vmatprep.mubr.bf16.mxu0 %v1867_v7 }
  0x9b   :  { %v554_v56 = vpop.permute.xlu0 %553  ;;  %v556_v57 = vpop.permute.xlu1 %555 }
  0x9c   :  { %v564_v59 = vsel %vm559_vm4, %v554_v56, %v556_v57 }
  0x9d   :  { %1702 = vmatmul.mubr.msk.bf16.vlgmr.msra.gmra.mrb[0].mxu1 %vm80_vm2, %v21_v55  ;;  %v582_v61 = vsel %vm84_vm1, %v564_v59, 0 }
  0x9e   :  { %289 = vmatpush1.bf16.msra.mxu1 %v236_v58  ;;  %320 = vmatprep.mubr.bf16.mxu1 %v1867_v7  ;;  %v1735_v58 = vld [vmem:[%s2221_s1 + $0x18] sm:$0xf] }
  0x9f   :  { %v558_v62 = vpop.permute.xlu0 %557  ;;  %v379_v63 = vpop.permute.xlu1 %378  ;;  %1705 = vmatprep.subr.msk.bf16.mxu1 %vm84_vm1, %v1934_v15 }
  0xa0   :  { %v565_v0 = vsel %vm559_vm4, %v556_v57, %v558_v62  ;;  %v390_v6 = vsel %vm386_vm3, %v379_v63, %v381_v42  ;;  %v389_v12 = vsel %vm386_vm3, %v1996_v36, %v379_v63 }
  0xa1   :  { %1716 = vmatmul.mubr.msk.bf16.vlgmr.msra.gmra.mrb[0].mxu0 %vm80_vm2, %v2046_v60  ;;  %1719 = vmatprep.subr.msk.bf16.mxu0 %vm84_vm1, %v565_v0  ;;  %v403_v17 = vsel %vm84_vm1, %v389_v12, 0 }
  0xa2   :  { %670 = vmatpush1.bf16.msra.mxu0 %v582_v61  ;;  %701 = vmatprep.mubr.bf16.mxu0 %v1867_v7 }
  0xa3   :  { %v719_v1 = vpop.permute.xlu0 %718  ;;  %v721_v2 = vpop.permute.xlu1 %720 }
  0xa4   :  { %v733_v5 = vsel %vm732_vm5, %v719_v1, %v721_v2 }
  0xa5   :  { %1704 = vmatmul.mubr.msk.bf16.vlgmr.msra.gmra.mrb[4].mxu1 %vm80_vm2, %v21_v55  ;;  %v743_v8 = vsel %vm84_vm1, %v733_v5, 0 }
  0xa6   :  { %330 = vmatpush1.bf16.msra.mxu1 %v242_v3  ;;  %361 = vmatprep.mubr.bf16.mxu1 %v1867_v7 }
  0xa7   :  { %1710 = vmatprep.subr.msk.bf16.mxu1 %vm84_vm1, %v390_v6  ;;  %v723_v9 = vpop.permute.xlu0 %722  ;;  %v727_v10 = vpop.permute.xlu1 %726 }
  0xa8   :  { %v734_v11 = vsel %vm732_vm5, %v721_v2, %v723_v9 }
  0xa9   :  { %1720 = vmatmul.mubr.msk.bf16.vlgmr.msra.gmra.mrb[4].mxu0 %vm80_vm2, %v2046_v60  ;;  %1722 = vmatprep.subr.msk.bf16.mxu0 %vm84_vm1, %v734_v11 }
  0xaa   :  { %761 = vmatpush1.bf16.msra.mxu0 %v743_v8  ;;  %792 = vmatprep.mubr.bf16.mxu0 %v1867_v7 }
  0xab   :  { %v729_v13 = vpop.permute.xlu0 %728  ;;  %v731_v14 = vpop.permute.xlu1 %730 }
  0xac   :  { %v737_v15 = vsel %vm732_vm5, %v727_v10, %v729_v13  ;;  %v738_v16 = vsel %vm732_vm5, %v729_v13, %v731_v14  ;;  %v1742_v14 = vld [vmem:[%s2221_s1 + $0x1c] sm:$0xf] }
  0xad   :  { %1706 = vmatmul.mubr.msk.bf16.vlgmr.msra.gmra.mrb[8].mxu1 %vm80_vm2, %v21_v55  ;;  %1726 = vmatprep.subr.msk.bf16.mxu0 %vm84_vm1, %v738_v16  ;;  %v755_v19 = vsel %vm84_vm1, %v737_v15, 0 }
  0xae   :  { %456 = vmatpush1.bf16.msra.mxu1 %v403_v17  ;;  %487 = vmatprep.mubr.bf16.mxu1 %v1867_v7 }
  0xaf   :  { %v552_v20 = vpop.permute.xlu0 %551  ;;  %v892_v21 = vpop.permute.xlu1 %891 }
  0xb0   :  { %v563_v22 = vsel %vm559_vm4, %v552_v20, %v554_v56  ;;  %v562_v23 = vsel %vm559_vm4, %v2023_v51, %v552_v20 }
  0xb1   :  { %1717 = vmatprep.subr.msk.bf16.mxu1 %vm84_vm1, %v563_v22  ;;  %1723 = vmatmul.mubr.msk.bf16.vlgmr.msra.gmra.mrb[0].mxu0 %vm80_vm2, %v2080_v18  ;;  %v576_v28 = vsel %vm84_vm1, %v562_v23, 0 }
  0xb2   :  { %843 = vmatpush1.bf16.msra.mxu0 %v755_v19  ;;  %874 = vmatprep.mubr.bf16.mxu0 %v1867_v7 }
  0xb3   :  { %v894_v24 = vpop.permute.xlu0 %893  ;;  %v896_v25 = vpop.permute.xlu1 %895 }
  0xb4   :  { %v906_v26 = vsel %vm905_vm6, %v892_v21, %v894_v24  ;;  %v907_v27 = vsel %vm905_vm6, %v894_v24, %v896_v25 }
  0xb5   :  { %1711 = vmatmul.mubr.msk.bf16.vlgmr.msra.gmra.mrb[4].mxu1 %vm80_vm2, %v2008_v41  ;;  %1729 = vmatprep.subr.msk.bf16.mxu0 %vm84_vm1, %v907_v27  ;;  %v916_v29 = vsel %vm84_vm1, %v906_v26, 0 }
  0xb6   :  { %629 = vmatpush1.bf16.msra.mxu1 %v576_v28  ;;  %660 = vmatprep.mubr.bf16.mxu1 %v1867_v7 }
  0xb7   :  { %v725_v30 = vpop.permute.xlu0 %724  ;;  %v900_v31 = vpop.permute.xlu1 %899 }
  0xb8   :  { %v736_v32 = vsel %vm732_vm5, %v725_v30, %v727_v10  ;;  %v735_v37 = vsel %vm732_vm5, %v723_v9, %v725_v30 }
  0xb9   :  { %1724 = vmatprep.subr.msk.bf16.mxu1 %vm84_vm1, %v736_v32  ;;  %1727 = vmatmul.mubr.msk.bf16.vlgmr.msra.gmra.mrb[4].mxu0 %vm80_vm2, %v2080_v18  ;;  %v749_v42 = vsel %vm84_vm1, %v735_v37, 0 }
  0xba   :  { %934 = vmatpush1.bf16.msra.mxu0 %v916_v29  ;;  %965 = vmatprep.mubr.bf16.mxu0 %v1867_v7 }
  0xbb   :  { %v902_v33 = vpop.permute.xlu0 %901  ;;  %v904_v34 = vpop.permute.xlu1 %903 }
  0xbc   :  { %v910_v35 = vsel %vm905_vm6, %v900_v31, %v902_v33  ;;  %v911_v36 = vsel %vm905_vm6, %v902_v33, %v904_v34 }
  0xbd   :  { %1733 = vmatprep.subr.msk.bf16.mxu0 %vm84_vm1, %v911_v36  ;;  %v928_v39 = vsel %vm84_vm1, %v910_v35, 0 }
  0xbf   :  { %v1065_v40 = vpop.permute.xlu0 %1064  ;;  %v1067_v41 = vpop.permute.xlu1 %1066 }
  0xc0   :  { %v1079_v45 = vsel %vm1078_vm7, %v1065_v40, %v1067_v41 }
  0xc1   :  { %1718 = vmatmul.mubr.msk.bf16.vlgmr.msra.gmra.mrb[4].mxu1 %vm80_vm2, %v2046_v60  ;;  %1730 = vmatmul.mubr.msk.bf16.vlgmr.msra.gmra.mrb[0].mxu0 %vm80_vm2, %v1728_v38  ;;  %v1089_v48 = vsel %vm84_vm1, %v1079_v45, 0 }
  0xc2   :  { %802 = vmatpush1.bf16.msra.mxu1 %v749_v42  ;;  %1016 = vmatpush1.bf16.msra.mxu0 %v928_v39 }
  0xc3   :  { %v1069_v43 = vpop.permute.xlu0 %1068  ;;  %v898_v44 = vpop.permute.xlu1 %897  ;;  %1047 = vmatprep.mubr.bf16.mxu0 %v1867_v7  ;;  %833 = vmatprep.mubr.bf16.mxu1 %v1867_v7 }
  0xc4   :  { %v1080_v46 = vsel %vm1078_vm7, %v1067_v41, %v1069_v43  ;;  %v909_v47 = vsel %vm905_vm6, %v898_v44, %v900_v31  ;;  %v908_v51 = vsel %vm905_vm6, %v896_v25, %v898_v44  ;;  %v1749_v31 = vld [vmem:[%s2221_s1 + $0x20] sm:$0xf]  ;;  %v1584_v44 = vsub.s32 0, %v1905_v4 }
  0xc5   :  { %1731 = vmatprep.subr.msk.bf16.mxu1 %vm84_vm1, %v909_v47  ;;  %1736 = vmatprep.subr.msk.bf16.mxu0 %vm84_vm1, %v1080_v46  ;;  %v922_v57 = vsel %vm84_vm1, %v908_v51, 0  ;;  %v1588_v46 = vsub.s32 1, %v1905_v4 }
  0xc7   :  { %v1073_v49 = vpop.permute.xlu0 %1072  ;;  %v1075_v50 = vpop.permute.xlu1 %1074 }
  0xc8   :  { %v1083_v54 = vsel %vm1078_vm7, %v1073_v49, %v1075_v50 }
  0xc9   :  { %1734 = vmatmul.mubr.msk.bf16.vlgmr.msra.gmra.mrb[4].mxu0 %vm80_vm2, %v1728_v38  ;;  %v1101_v59 = vsel %vm84_vm1, %v1083_v54, 0 }
  0xca   :  { %1107 = vmatpush1.bf16.msra.mxu0 %v1089_v48  ;;  %1138 = vmatprep.mubr.bf16.mxu0 %v1867_v7 }
  0xcb   :  { %v1077_v52 = vpop.permute.xlu0 %1076  ;;  %v1071_v53 = vpop.permute.xlu1 %1070 }
  0xcc   :  { %v1084_v55 = vsel %vm1078_vm7, %v1075_v50, %v1077_v52  ;;  %v1082_v56 = vsel %vm1078_vm7, %v1071_v53, %v1073_v49  ;;  %v1081_v2 = vsel %vm1078_vm7, %v1069_v43, %v1071_v53  ;;  %v1592_v52 = vsub.s32 2, %v1905_v4 }
  0xcd   :  { %1725 = vmatmul.mubr.msk.bf16.vlgmr.msra.gmra.mrb[4].mxu1 %vm80_vm2, %v2080_v18  ;;  %1740 = vmatprep.subr.msk.bf16.mxu0 %vm84_vm1, %v1084_v55  ;;  %v1095_v9 = vsel %vm84_vm1, %v1081_v2, 0  ;;  %v1596_v53 = vsub.s32 3, %v1905_v4  ;;  %v1600_v55 = vsub.s32 4, %v1905_v4 }
  0xce   :  { %975 = vmatpush1.bf16.msra.mxu1 %v922_v57  ;;  %1006 = vmatprep.mubr.bf16.mxu1 %v1867_v7 }
  0xcf   :  { %v1238_v60 = vpop.permute.xlu0 %1237  ;;  %1738 = vmatprep.subr.msk.bf16.mxu1 %vm84_vm1, %v1082_v56  ;;  %v1240_v61 = vpop.permute.xlu1 %1239 }
  0xd0   :  { %v1252_v0 = vsel %vm1251_vm8, %v1238_v60, %v1240_v61 }
  0xd1   :  { %1737 = vmatmul.mubr.msk.bf16.vlgmr.msra.gmra.mrb[0].mxu0 %vm80_vm2, %v1735_v58  ;;  %v1262_v5 = vsel %vm84_vm1, %v1252_v0, 0  ;;  %v1604_v0 = vsub.s32 5, %v1905_v4 }
  0xd2   :  { %1189 = vmatpush1.bf16.msra.mxu0 %v1101_v59  ;;  %1220 = vmatprep.mubr.bf16.mxu0 %v1867_v7 }
  0xd3   :  { %v1242_v62 = vpop.permute.xlu0 %1241  ;;  %v1246_v63 = vpop.permute.xlu1 %1245 }
  0xd4   :  { %v1253_v1 = vsel %vm1251_vm8, %v1240_v61, %v1242_v62 }
  0xd5   :  { %1743 = vmatprep.subr.msk.bf16.mxu0 %vm84_vm1, %v1253_v1 }
  0xd7   :  { %v1248_v3 = vpop.permute.xlu0 %1247  ;;  %v1250_v6 = vpop.permute.xlu1 %1249 }
  0xd8   :  { %v1257_v8 = vsel %vm1251_vm8, %v1248_v3, %v1250_v6  ;;  %v1256_v13 = vsel %vm1251_vm8, %v1246_v63, %v1248_v3 }
  0xd9   :  { %1732 = vmatmul.mubr.msk.bf16.vlgmr.msra.gmra.mrb[4].mxu1 %vm80_vm2, %v1728_v38  ;;  %1741 = vmatmul.mubr.msk.bf16.vlgmr.msra.gmra.mrb[4].mxu0 %vm80_vm2, %v1735_v58  ;;  %v1274_v15 = vsel %vm84_vm1, %v1256_v13, 0 }
  0xda   :  { %1148 = vmatpush1.bf16.msra.mxu1 %v1095_v9  ;;  %1280 = vmatpush1.bf16.msra.mxu0 %v1262_v5 }
  0xdb   :  { %v1244_v10 = vpop.permute.xlu0 %1243  ;;  %1311 = vmatprep.mubr.bf16.mxu0 %v1867_v7  ;;  %1747 = vmatprep.subr.msk.bf16.mxu0 %vm84_vm1, %v1257_v8  ;;  %v1411_v11 = vpop.permute.xlu1 %1410 }
  0xdc   :  { %v1255_v12 = vsel %vm1251_vm8, %v1244_v10, %v1246_v63  ;;  %1179 = vmatprep.mubr.bf16.mxu1 %v1867_v7  ;;  %v1254_v18 = vsel %vm1251_vm8, %v1242_v62, %v1244_v10 }
  0xdd   :  { %1745 = vmatprep.subr.msk.bf16.mxu1 %vm84_vm1, %v1255_v12  ;;  %v1268_v20 = vsel %vm84_vm1, %v1254_v18, 0 }
  0xdf   :  { %v1413_v16 = vpop.permute.xlu0 %1412  ;;  %v1415_v17 = vpop.permute.xlu1 %1414 }
  0xe0   :  { %v1426_v19 = vsel %vm1424_vm9, %v1413_v16, %v1415_v17  ;;  %v1425_v23 = vsel %vm1424_vm9, %v1411_v11, %v1413_v16 }
  0xe1   :  { %1744 = vmatmul.mubr.msk.bf16.vlgmr.msra.gmra.mrb[0].mxu0 %vm80_vm2, %v1742_v14  ;;  %v1435_v25 = vsel %vm84_vm1, %v1425_v23, 0 }
  0xe2   :  { %1362 = vmatpush1.bf16.msra.mxu0 %v1274_v15  ;;  %1393 = vmatprep.mubr.bf16.mxu0 %v1867_v7 }
  0xe3   :  { %1750 = vmatprep.subr.msk.bf16.mxu0 %vm84_vm1, %v1426_v19  ;;  %v1417_v21 = vpop.permute.xlu0 %1416  ;;  %v1419_v22 = vpop.permute.xlu1 %1418 }
  0xe4   :  { %v1428_v24 = vsel %vm1424_vm9, %v1417_v21, %v1419_v22  ;;  %v1427_v29 = vsel %vm1424_vm9, %v1415_v17, %v1417_v21 }
  0xe5   :  { %1739 = vmatmul.mubr.msk.bf16.vlgmr.msra.gmra.mrb[4].mxu1 %vm80_vm2, %v1735_v58  ;;  %v1441_v32 = vsel %vm84_vm1, %v1427_v29, 0 }
  0xe6   :  { %1321 = vmatpush1.bf16.msra.mxu1 %v1268_v20  ;;  %1352 = vmatprep.mubr.bf16.mxu1 %v1867_v7 }
  0xe7   :  { %v1421_v26 = vpop.permute.xlu0 %1420  ;;  %v1423_v27 = vpop.permute.xlu1 %1422  ;;  %1752 = vmatprep.subr.msk.bf16.mxu1 %vm84_vm1, %v1428_v24 }
  0xe8   :  { %v1430_v28 = vsel %vm1424_vm9, %v1421_v26, %v1423_v27  ;;  %v1429_v30 = vsel %vm1424_vm9, %v1419_v22, %v1421_v26 }
  0xe9   :  { %1748 = vmatmul.mubr.msk.bf16.vlgmr.msra.gmra.mrb[4].mxu0 %vm80_vm2, %v1742_v14  ;;  %v1447_v33 = vsel %vm84_vm1, %v1429_v30, 0 }
  0xea   :  { %1453 = vmatpush1.bf16.msra.mxu0 %v1435_v25  ;;  %1484 = vmatprep.mubr.bf16.mxu0 %v1867_v7 }
  0xeb   :  { %1754 = vmatprep.subr.msk.bf16.mxu0 %vm84_vm1, %v1430_v28 }
  0xf1   :  { %1746 = vmatmul.mubr.msk.bf16.vlgmr.msra.gmra.mrb[4].mxu1 %vm80_vm2, %v1742_v14  ;;  %1751 = vmatmul.mubr.msk.bf16.vlgmr.msra.gmra.mrb[0].mxu0 %vm80_vm2, %v1749_v31 }
  0xf2   :  { %1494 = vmatpush1.bf16.msra.mxu1 %v1441_v32  ;;  %1535 = vmatpush1.bf16.msra.mxu0 %v1447_v33 }
  0xf3   :  { %1566 = vmatprep.mubr.bf16.mxu0 %v1867_v7  ;;  %1525 = vmatprep.mubr.bf16.mxu1 %v1867_v7  ;;  %v20_v7 = vld [vmem:[%s2222_s3] sm:$0x3f] }
  0xf4   :  { %v1585_v50 = vrot.slane %v20_v7, %v1584_v44  ;;  %v1589_v51 = vrot.slane %v20_v7, %v1588_v46  ;;  %v1593_v60 = vrot.slane %v20_v7, %v1592_v52  ;;  %v1597_v63 = vrot.slane %v20_v7, %v1596_v53 }
  0xf5   :  { %v1601_v5 = vrot.slane %v20_v7, %v1600_v55  ;;  %v1605_v11 = vrot.slane %v20_v7, %v1604_v0  ;;  %v1876_v44 = vmov 1  }
  0xf6   :  { %1860 = vset.pattern.permute.xlu1 %v1876_v44 }
  0xf9   :  { %1755 = vmatmul.mubr.msk.bf16.vlgmr.msra.gmra.mrb[4].mxu0 %vm80_vm2, %v1749_v31 }
  0xfd   :  { %1753 = vmatmul.mubr.msk.bf16.vlgmr.msra.gmra.mrb[4].mxu1 %vm80_vm2, %v1749_v31 }
 0x170   :  { %v281_v34 = vpop.f32.mrb[0].mxu1 }
 0x171   :  { %v283_v35 = vpop.f32.mrb[1].mxu1 }
 0x172   :  { %v285_v36 = vpop.f32.mrb[2].mxu1 }
 0x173   :  { %v286_v37 = vpop.f32.mrb[3].mxu1 }
 0x180   :  { %v363_v38 = vpop.f32.mrb[8].mxu1 }
 0x181   :  { %v365_v39 = vpop.f32.mrb[9].mxu1 }
 0x182   :  { %v367_v40 = vpop.f32.mrb[10].mxu1 }
 0x183   :  { %v368_v41 = vpop.f32.mrb[11].mxu1 }
 0x1c4   :  { %v1486_v42 = vpop.f32.mrb[0].mxu0 }
 0x1c5   :  { %v1756_v43 = vadd.f32 %v1486_v42, %v281_v34  ;;  %v1488_v45 = vpop.f32.mrb[1].mxu0 }
 0x1c6   :  { %v1757_v47 = vadd.f32 %v1488_v45, %v283_v35  ;;  %v1490_v48 = vpop.f32.mrb[2].mxu0 }
 0x1c7   :  { %v1491_v49 = vpop.f32.mrb[3].mxu0  ;;  %v1612_v56 = vmul.f32 %v1756_v43, %v1585_v50 }
 0x1c8   :  { %v1613_v57 = vmul.f32 %v1757_v47, %v1589_v51 }
 0x1ca   :  { %v1618_v3 = vadd.f32 %v1613_v57, %v1612_v56 }
 0x1cc   :  { %v1568_v54 = vpop.f32.mrb[4].mxu0 }
 0x1cd   :  { %v1758_v58 = vadd.f32 %v1568_v54, %v363_v38  ;;  %v1570_v59 = vpop.f32.mrb[5].mxu0 }
 0x1ce   :  { %v1759_v61 = vadd.f32 %v1570_v59, %v365_v39  ;;  %v1572_v62 = vpop.f32.mrb[6].mxu0 }
 0x1cf   :  { %v1573_v1 = vpop.f32.mrb[7].mxu0  ;;  %v1616_v14 = vmul.f32 %v1758_v58, %v1601_v5 }
 0x1d0   :  { %v1527_v2 = vpop.f32.mrb[4].mxu1  ;;  %v1617_v16 = vmul.f32 %v1759_v61, %v1605_v11 }
 0x1d1   :  { %v1614_v6 = vmul.f32 %v1593_v60, %v1527_v2  ;;  %v1529_v8 = vpop.f32.mrb[5].mxu1 }
 0x1d2   :  { %v1615_v9 = vmul.f32 %v1597_v63, %v1529_v8  ;;  %v1531_v10 = vpop.f32.mrb[6].mxu1 }
 0x1d3   :  { %v1619_v12 = vadd.f32 %v1618_v3, %v1614_v6  ;;  %v1532_v13 = vpop.f32.mrb[7].mxu1 }
 0x1d5   :  { %v1620_v15 = vadd.f32 %v1619_v12, %v1615_v9 }
 0x1d7   :  { %v1621_v17 = vadd.f32 %v1620_v15, %v1616_v14 }
 0x1d9   :  { %v1622_v18 = vadd.f32 %v1621_v17, %v1617_v16 }
 0x1db   :  { %1623 = vadd.xlane.f32.xlu0 %v1622_v18 }
 0x268   :  { %v1624_v19 = vpop.xlane.xlu0 %1623 }
 0x269   :  { %v1625_v20 = vmul.f32 0.001953125, %v1624_v19 }
 0x26b   :  { %v1626_v4 = vsub.f32 %v1756_v43, %v1625_v20  ;;  %v1627_v21 = vsub.f32 %v1757_v47, %v1625_v20  ;;  %v1628_v22 = vsub.f32 %v1527_v2, %v1625_v20  ;;  %v1629_v23 = vsub.f32 %v1529_v8, %v1625_v20  ;;  %v1652_v43 = vld [vmem:[%s2223_s2] sm:$0xff] }
 0x26c   :  { %v1630_v24 = vsub.f32 %v1758_v58, %v1625_v20  ;;  %v1631_v28 = vsub.f32 %v1759_v61, %v1625_v20 }
 0x26d   :  { %v1632_v25 = vmul.f32 %v1626_v4, %v1626_v4  ;;  %v1633_v26 = vmul.f32 %v1627_v21, %v1627_v21  ;;  %v1634_v27 = vmul.f32 %v1628_v22, %v1628_v22  ;;  %v1635_v29 = vmul.f32 %v1629_v23, %v1629_v23 }
 0x26e   :  { %v1636_v32 = vmul.f32 %v1630_v24, %v1630_v24  ;;  %v1637_v35 = vmul.f32 %v1631_v28, %v1631_v28 }
 0x26f   :  { %v1638_v30 = vmul.f32 %v1632_v25, %v1585_v50  ;;  %v1639_v31 = vmul.f32 %v1633_v26, %v1589_v51  ;;  %v1640_v33 = vmul.f32 %v1634_v27, %v1593_v60  ;;  %v1641_v36 = vmul.f32 %v1635_v29, %v1597_v63 }
 0x270   :  { %v1642_v38 = vmul.f32 %v1636_v32, %v1601_v5  ;;  %v1643_v40 = vmul.f32 %v1637_v35, %v1605_v11 }
 0x271   :  { %v1644_v34 = vadd.f32 %v1639_v31, %v1638_v30 }
 0x273   :  { %v1645_v37 = vadd.f32 %v1644_v34, %v1640_v33 }
 0x275   :  { %v1646_v39 = vadd.f32 %v1645_v37, %v1641_v36 }
 0x277   :  { %v1647_v41 = vadd.f32 %v1646_v39, %v1642_v38 }
 0x279   :  { %v1648_v42 = vadd.f32 %v1647_v41, %v1643_v40 }
 0x27b   :  { %1649 = vadd.xlane.f32.xlu1 %v1648_v42 }
 0x28c   :  { %1669 = vperm.xlu1 %1860, %v1652_v43  }
 0x308   :  { %v1650_v45 = vpop.xlane.xlu1 %1649 }
 0x309   :  { %v1651_v46 = vmul.f32 0.001953125, %v1650_v45 }
 0x30b   :  { %v1653_v7 = vadd.f32 1e-05, %v1651_v46 }
 0x30c   :  { %v1670_v50 = vpop.permute.xlu1 %1669 }
 0x30d   :  { %1864 = vrsqrt.f32 %v1653_v7 }
 0x317   :  { %v1865_v47 = vpop.eup %1864 }
 0x318   :  { %v1655_v48 = vmul.f32 %v1865_v47, %v1652_v43 }
 0x31a   :  { %1658 = vperm.xlu0 %1859, %v1655_v48  }
 0x31e   :  { %1861 = vset.pattern.permute.xlu0 %v1876_v44 }
 0x399   :  { %v1659_v49 = vpop.permute.xlu0 %1658 }
 0x39a   :  { %v1661_v51 = vmul.f32 %v1659_v49, %v1626_v4  ;;  %v1662_v52 = vmul.f32 %v1659_v49, %v1627_v21  ;;  %v1663_v53 = vmul.f32 %v1659_v49, %v1628_v22  ;;  %v1664_v54 = vmul.f32 %v1659_v49, %v1629_v23 }
 0x39b   :  { %v1665_v55 = vmul.f32 %v1659_v49, %v1630_v24  ;;  %v1666_v56 = vmul.f32 %v1659_v49, %v1631_v28 }
 0x39c   :  { %v1672_v57 = vadd.f32 %v1670_v50, %v1661_v51  ;;  %v1673_v58 = vadd.f32 %v1670_v50, %v1662_v52  ;;  %v1674_v59 = vadd.f32 %v1670_v50, %v1663_v53  ;;  %v1675_v60 = vadd.f32 %v1670_v50, %v1664_v54 }
 0x39d   :  { %v1676_v61 = vadd.f32 %v1670_v50, %v1665_v55  ;;  %v1677_v62 = vadd.f32 %v1670_v50, %v1666_v56 }
 0x39e   :  { %v1678_v63 = vmax.f32 %v1672_v57, 0.0  ;;  %v1679_v0 = vmax.f32 %v1673_v58, 0.0  ;;  %v1680_v1 = vmax.f32 %v1674_v59, 0.0  ;;  %v1681_v2 = vmax.f32 %v1675_v60, 0.0 }
 0x39f   :  { %v1682_v3 = vmax.f32 %v1676_v61, 0.0  ;;  %v1683_v5 = vmax.f32 %v1677_v62, 0.0 }
 0x3a0   :  { %1684 = vst [vmem:[%s2224_s4] sm:$0xff] %v1678_v63  ;;  %1685 = vst [vmem:[%s2224_s4 + $0x8] sm:$0xff] %v1679_v0 }
 0x3a1   :  { %1686 = vst [vmem:[%s2224_s4 + $0x10] sm:$0xff] %v1680_v1  ;;  %1687 = vst [vmem:[%s2224_s4 + $0x18] sm:$0xff] %v1681_v2 }
 0x3a2   :  { %1688 = vst [vmem:[%s2224_s4 + $0x20] sm:$0xff] %v1682_v3  ;;  %1689 = vst [vmem:[%s2224_s4 + $0x28] sm:$0xff] %v1683_v5 }

</bundles_post_ra>
